<compile_context>
chip_gen: v6e
topology: v6e:2x2x1
jax: 0.10.0
libtpu: 0.0.40
codegen_flags: <defaults>
</compile_context>

<pallas_src>
import math

import jax
import jax.numpy as jnp
from jax.experimental import pallas as pl
from jax.experimental.pallas import tpu as pltpu


_VMEM_LIMIT_BYTES = 32 << 20   # explicit scoped-VMEM limit (safe on v5e/v6e/v7x)
_VMEM_BUDGET_BYTES = 26 << 20  # what we let the tile buffers use (headroom left)


def _posenc_kernel(x_ref, pe_ref, o_ref):
    """One sequence tile: out = x + pe, pe broadcast over the batch (sublane) axis.

    x_ref / o_ref : (ts, B, D) activation tile.
    pe_ref        : (ts, 1, D) f32 table tile, streamed & double-buffered by BlockSpec.
    Add in f32 (parity with PyTorch's f32 pe buffer), cast back on store.
    """
    o_ref[...] = (x_ref[...].astype(jnp.float32) + pe_ref[...]).astype(o_ref.dtype)


def make_pe_table(d_model: int, max_len: int = 100) -> jnp.ndarray:
    """Deterministic sinusoidal table, shape (max_len, 1, d_model), float32."""
    position = jnp.arange(0, max_len, dtype=jnp.float32)[:, None]            # (L, 1)
    div_term = jnp.exp(
        jnp.arange(0, d_model, 2, dtype=jnp.float32) * (-math.log(10000.0) / d_model)
    )                                                                        # (ceil(D/2),)
    pe = jnp.zeros((max_len, d_model), dtype=jnp.float32)
    pe = pe.at[:, 0::2].set(jnp.sin(position * div_term))
    # Odd-d_model: the number of cos columns is D//2, so slice div_term accordingly.
    pe = pe.at[:, 1::2].set(jnp.cos(position * div_term[: d_model // 2]))
    return pe[:, None, :]                                                    # (L, 1, D)


def _target_tile_bytes() -> int:
    """~6 MiB x tiles on 64-MiB-VMEM parts (v7x-class), ~4 MiB elsewhere."""
    try:
        info = pltpu.get_tpu_info()
        vmem = int(getattr(info, "vmem_capacity_bytes", 0) or 0)
        if 0 < vmem <= (64 << 20):
            return 6 << 20
    except Exception:
        pass
    return 4 << 20


def _num_tensorcores() -> int:
    """Best-effort TensorCores-per-device query; 1 if unknown (v5e/v6e)."""
    try:
        dev = jax.devices()[0]
        for attr in ("num_cores", "core_count"):
            v = getattr(dev, attr, None)
            if v:
                return int(v)
    except Exception:
        pass
    return 1


def _choose_seq_tile(S: int, B: int, D: int, x_itemsize: int, pe_itemsize: int,
                     target_bytes: int, vmem_budget: int, num_cores: int) -> int:
    """Pick the number of sequence rows per tile.

    Primary heuristic: x tile ~= target_bytes of HBM traffic (amortizes the
    ~0.35 us fixed per-grid-step cost).  Secondary: keep the double-buffered
    in/out/pe tiles under the scoped-VMEM budget (using lane/sublane-padded
    sizes).  On multi-TC parts keep >= num_cores grid steps so the "parallel"
    axis shards; on single-TC parts prefer one maximal tile.
    """
    lane_d = pl.cdiv(D, 128) * 128
    row_x_hbm = max(1, B * D * x_itemsize)
    row_x_vmem = pl.cdiv(B, 8) * 8 * lane_d * x_itemsize
    row_pe_vmem = 8 * lane_d * pe_itemsize            # (1, D) tail -> sublane pads to 8
    per_row_vmem = 4 * row_x_vmem + 2 * row_pe_vmem   # 2x(in + out) + 2x pe buffers

    ts = max(1, min(target_bytes // row_x_hbm, vmem_budget // per_row_vmem))
    if num_cores > 1 and S > 1:
        ts = min(ts, pl.cdiv(S, num_cores))           # keep the 2 TCs both busy
    ts = min(ts, S)
    if ts >= 8:
        ts -= ts % 8                                  # sublane-aligned rows, after the cap
    return max(1, ts)


def positional_encoding(x: jnp.ndarray, pe: jnp.ndarray) -> jnp.ndarray:
    """x: (S, B, D); pe: (max_len, 1, D) float32.  Returns x + pe[:S] (dropout = identity)."""
    S, B, D = x.shape
    max_len = pe.shape[0]
    assert S <= max_len, "sequence length exceeds positional-encoding table"
    assert pe.shape[2] == D

    ts = _choose_seq_tile(S, B, D, x.dtype.itemsize, pe.dtype.itemsize,
                          _target_tile_bytes(), _VMEM_BUDGET_BYTES, _num_tensorcores())
    num_tiles = pl.cdiv(S, ts)

    out = pl.pallas_call(
        _posenc_kernel,
        out_shape=jax.ShapeDtypeStruct((S, B, D), x.dtype),
        grid_spec=pltpu.PrefetchScalarGridSpec(
            num_scalar_prefetch=0,
            grid=(num_tiles,),
            in_specs=[
                # Large sequence tiles; (B, D) equal the full dims -> legal blocks.
                pl.BlockSpec((ts, B, D), lambda i: (i, 0, 0)),
                # pe streamed per tile (same row-tile index), double-buffered.
                pl.BlockSpec((ts, 1, D), lambda i: (i, 0, 0)),
            ],
            out_specs=pl.BlockSpec((ts, B, D), lambda i: (i, 0, 0)),
        ),
        input_output_aliases={0: 0},   # in-place add on x's buffer
        cost_estimate=pl.CostEstimate(
            flops=S * B * D,
            transcendentals=0,
            bytes_accessed=2 * S * B * D * x.dtype.itemsize + S * D * pe.dtype.itemsize,
        ),
        compiler_params=pltpu.CompilerParams(
            dimension_semantics=("parallel",),        # seq-tile axis shards across TCs
            vmem_limit_bytes=_VMEM_LIMIT_BYTES,
        ),
    )(x, pe)

    # nn.Dropout(p=0.1) is identity in eval/deploy (ONNX export) mode.
    # TODO(synk): fuse training-mode dropout / fold the add into the consumer op.
    return out


if __name__ == "__main__":
    key = jax.random.PRNGKey(0)
    S, B, D = 8, 2, 32          # seq=8, batch=2, d_model=32
    max_len = 100

    x = jax.random.normal(key, (S, B, D), dtype=jnp.float32)
    pe = make_pe_table(D, max_len)

    # Reference computed before the kernel call (kernel aliases x's buffer).
    ref = x + pe[:S].astype(x.dtype)

    y = positional_encoding(x, pe)
    y = jax.block_until_ready(y)

    assert y.shape == (S, B, D)
    assert jnp.allclose(y, ref, atol=1e-6), "mismatch vs reference"

    print("KERNEL_OK")
</pallas_src>

<mosaic_0001>
module attributes {stable_mosaic.version = 11 : i64} {
  func.func @_posenc_kernel(%arg0: i32, %arg1: memref<8x2x32xf32, #tpu.memory_space<vmem>>, %arg2: memref<8x1x32xf32, #tpu.memory_space<vmem>>, %arg3: memref<8x2x32xf32, #tpu.memory_space<vmem>>) attributes {dimension_semantics = [#tpu.dimension_semantics<parallel>], iteration_bounds = array<i64: 1>, scalar_prefetch = 0 : i64, scratch_operands = 0 : i64, tpu.core_type = #tpu.core_type<tc>, window_params = [{transform_indices = @transform_0, window_bounds = array<i64: 8, 2, 32>}, {transform_indices = @transform_1, window_bounds = array<i64: 8, 1, 32>}, {transform_indices = @transform_2, window_bounds = array<i64: 8, 2, 32>}]} {
    %c0 = arith.constant 0 : index
    %c0_0 = arith.constant 0 : index
    %c0_1 = arith.constant 0 : index
    %0 = vector.load %arg1[%c0, %c0_0, %c0_1] : memref<8x2x32xf32, #tpu.memory_space<vmem>>, vector<8x2x32xf32>
    %c0_2 = arith.constant 0 : index
    %c0_3 = arith.constant 0 : index
    %c0_4 = arith.constant 0 : index
    %1 = vector.load %arg2[%c0_2, %c0_3, %c0_4] : memref<8x1x32xf32, #tpu.memory_space<vmem>>, vector<8x1x32xf32>
    %2 = vector.broadcast %1 : vector<8x1x32xf32> to vector<8x2x32xf32>
    %3 = arith.addf %0, %2 : vector<8x2x32xf32>
    %c0_5 = arith.constant 0 : index
    %c0_6 = arith.constant 0 : index
    %c0_7 = arith.constant 0 : index
    %4 = vector.load %arg3[%c0_5, %c0_6, %c0_7] : memref<8x2x32xf32, #tpu.memory_space<vmem>>, vector<8x2x32xf32>
    tpu.vector_store %arg3[%c0_5, %c0_6, %c0_7], %3 {strides = array<i32>} : memref<8x2x32xf32, #tpu.memory_space<vmem>>, vector<8x2x32xf32>,
    return
  }
  func.func @transform_0(%arg0: i32) -> (i32, i32, i32) {
    %c0_i32 = arith.constant 0 : i32
    %c0_i32_0 = arith.constant 0 : i32
    %c0_i32_1 = arith.constant 0 : i32
    return %arg0, %c0_i32, %c0_i32_0 : i32, i32, i32
  }
  func.func @transform_1(%arg0: i32) -> (i32, i32, i32) {
    %c0_i32 = arith.constant 0 : i32
    %c0_i32_0 = arith.constant 0 : i32
    %c0_i32_1 = arith.constant 0 : i32
    return %arg0, %c0_i32, %c0_i32_0 : i32, i32, i32
  }
  func.func @transform_2(%arg0: i32) -> (i32, i32, i32) {
    %c0_i32 = arith.constant 0 : i32
    %c0_i32_0 = arith.constant 0 : i32
    %c0_i32_1 = arith.constant 0 : i32
    return %arg0, %c0_i32, %c0_i32_0 : i32, i32, i32
  }
}

</mosaic_0001>

<bundles_post_ra>
// kernel: tpu_custom_call.1
= control target key start
LH: loop header
LB: loop body
LE: loop exit
PB: predicated region body
PF: predicated region fallthrough
CT: control target
= control target key end

     0   :  { %7 = vsyncpa [#allocation3], 0  ;;  %s246_s0 = inlined_call_operand.hbm [shape: f32[8,2,32], index: 0, kind: input, shape index: {}, may-alias: {0,2}]   ;;  %s247_s1 = inlined_call_operand.vmem [shape: f32[100,1,32], index: 1, kind: input, shape index: {}]   ;;  %s248_s2 = inlined_call_operand.hbm [shape: f32[8,2,32], index: 2, kind: output, shape index: {}, may-alias: {0,2}]  }
   0x1   :  { %8 = vsyncpa [#allocation4], 0  ;;  %s180_s9 = smov [#allocation2]  }
   0x2   :  { %s14_s10 = sshll.u32 %s180_s9, 4  ;;  %s15_s10 = int_to_ptr.vmem [resolvable:$true] %s14_s10 }
   0x3   :  { %s144_s11 = scalar_lea.vmem %s15_s10, 256  ;;  %p149_p1 = scmp.lt.s32.totalorder %s15_s10, %s15_s10 }
   0x4   :  { %p145_p0 = scmp.ne.s32.totalorder %s15_s10, %s144_s11  ;;  %p150_p2 = scmp.lt.s32.totalorder %s144_s11, %s144_s11 }
   0x6   :  { %p151_p3 = por %p150_p2, %p149_p1 }
   0x8   :  { %p152_p4 = pnand %p151_p3, %p145_p0 }
   0xa   :  { %155 = shalt.err (!%p152_p4)
}
   0xb   :  { %s181_s12 = smov 32   ;;  %s182_s13 = smov 2  }
   0xc   :  { %20 = dma.hbm_to_vmem [thread:$0]  %s246_s0, 256, %s15_s10, [#allocation3], %s181_s12, %s181_s12, %s182_s13  }
   0xd   :  { %176 = dma.done.wait [#allocation3], 256  }
   0xe   :  { %177 = vsyncadd [#allocation3], 4294967040  ;;  %vm98_vm0 = vcmask 254976   ;;  %s183_s16 = smov [#allocation5]   ;;  %v26_v0 = vld [vmem:[#allocation2] sm:$0x3] }
   0xf   :  { %s205_s17 = sshll.u32 %s183_s16, 4  ;;  %v124_v1 = vld [vmem:[%s247_s1] ss:$0 sm:$0xff]  ;;  %v27_v2 = vld [vmem:[#allocation2 + $0x2] sm:$0x3]  ;;  %s113_s17 = int_to_ptr.vmem [resolvable:$true] %s205_s17 }
  0x10   :  { %v90_v3 = vadd.f32 %v124_v1, %v26_v0  ;;  %v125_v4 = vld [vmem:[%s247_s1 + $0x1] ss:$0 sm:$0xff]  ;;  %v28_v5 = vld [vmem:[#allocation2 + $0x4] sm:$0x3]  ;;  %v126_v6 = vld [vmem:[%s247_s1 + $0x2] ss:$0 sm:$0xff]  ;;  %p161_p6 = scmp.lt.s32.totalorder %s113_s17, %s113_s17 }
  0x11   :  { %v91_v7 = vadd.f32 %v125_v4, %v27_v2  ;;  %v92_v8 = vadd.f32 %v126_v6, %v28_v5  ;;  %v29_v9 = vld [vmem:[#allocation2 + $0x6] sm:$0x3]  ;;  %v127_v10 = vld [vmem:[%s247_s1 + $0x3] ss:$0 sm:$0xff]  ;;  %v30_v11 = vld [vmem:[#allocation2 + $0x8] sm:$0x3] }
  0x12   :  { %99 = vst.msk [vmem:[#allocation5] sm:$0x3] %vm98_vm0, %v90_v3  ;;  %v93_v12 = vadd.f32 %v127_v10, %v29_v9  ;;  %v128_v13 = vld [vmem:[%s247_s1 + $0x4] ss:$0 sm:$0xff]  ;;  %v31_v14 = vld [vmem:[#allocation2 + $0xa] sm:$0x3] }
  0x13   :  { %v129_v15 = vld [vmem:[%s247_s1 + $0x5] ss:$0 sm:$0xff]  ;;  %100 = vst.msk [vmem:[#allocation5 + $0x2] sm:$0x3] %vm98_vm0, %v91_v7  ;;  %101 = vst.msk [vmem:[#allocation5 + $0x4] sm:$0x3] %vm98_vm0, %v92_v8  ;;  %v94_v16 = vadd.f32 %v128_v13, %v30_v11 }
  0x14   :  { %v95_v17 = vadd.f32 %v129_v15, %v31_v14  ;;  %v32_v18 = vld [vmem:[#allocation2 + $0xc] sm:$0x3]  ;;  %v130_v19 = vld [vmem:[%s247_s1 + $0x6] ss:$0 sm:$0xff]  ;;  %v33_v20 = vld [vmem:[#allocation2 + $0xe] sm:$0x3] }
  0x15   :  { %102 = vst.msk [vmem:[#allocation5 + $0x6] sm:$0x3] %vm98_vm0, %v93_v12  ;;  %v96_v21 = vadd.f32 %v130_v19, %v32_v18  ;;  %v131_v22 = vld [vmem:[%s247_s1 + $0x7] ss:$0 sm:$0xff]  ;;  %103 = vst.msk [vmem:[#allocation5 + $0x8] sm:$0x3] %vm98_vm0, %v94_v16 }
  0x16   :  { %104 = vst.msk [vmem:[#allocation5 + $0xa] sm:$0x3] %vm98_vm0, %v95_v17  ;;  %v97_v23 = vadd.f32 %v131_v22, %v33_v20  ;;  %s156_s5 = scalar_lea.vmem %s113_s17, 256 }
  0x17   :  { %105 = vst.msk [vmem:[#allocation5 + $0xc] sm:$0x3] %vm98_vm0, %v96_v21  ;;  %p157_p5 = scmp.ne.s32.totalorder %s113_s17, %s156_s5  ;;  %p162_p7 = scmp.lt.s32.totalorder %s156_s5, %s156_s5 }
  0x18   :  { %106 = vst.msk [vmem:[#allocation5 + $0xe] sm:$0x3] %vm98_vm0, %v97_v23 }
  0x19   :  { %p163_p8 = por %p162_p7, %p161_p6 }
  0x1b   :  { %p164_p9 = pnand %p163_p8, %p157_p5 }
  0x1d   :  { %167 = shalt.err (!%p164_p9)
}
  0x1e   :  { %118 = dma.vmem_to_hbm [thread:$0]  %s113_s17, 256, %s248_s2, [#allocation4], %s181_s12, %s181_s12, %s182_s13  }
  0x1f   :  { %178 = dma.done.wait [#allocation4], 256  }
  0x20   :  { %179 = vsyncadd [#allocation4], 4294967040 }
  0x21   :  { %122 = vsyncpa [#allocation3], 1 }
  0x22   :  { %123 = vsyncpa [#allocation4], 1 }

</bundles_post_ra>
